<compile_context>
chip_gen: v7x
topology: tpu7x:2x2x1
jax: 0.10.0
libtpu: 0.0.40
codegen_flags: <defaults>
</compile_context>

<pallas_src>
import functools

import numpy as np
import jax
import jax.numpy as jnp
from jax.experimental import pallas as pl
from jax.experimental.pallas import tpu as pltpu


# --------------------------------------------------------------------------
# 2-D DFT matrices in Kronecker form, bf16 weights (f32 accumulation in-kernel)
# --------------------------------------------------------------------------
def _kron_dft_matrices(n: int):
    """Return (Kr, Ki), each (n*n, n*n) bfloat16, with

        K[(u*n+v), (h*n+w)] = exp(-2j*pi*(u*h + v*w)/n)   (symmetric),

    so the 2-D forward DFT of a row-major-flattened plane x is x_flat @ K and
    the 2-D inverse DFT is x_flat @ conj(K) / n^2."""
    k = np.arange(n)
    ang = -2.0 * np.pi * np.outer(k, k) / n
    fr = np.cos(ang)
    fi = np.sin(ang)
    kr = np.kron(fr, fr) - np.kron(fi, fi)
    ki = np.kron(fr, fi) + np.kron(fi, fr)
    return jnp.asarray(kr, jnp.bfloat16), jnp.asarray(ki, jnp.bfloat16)


# --------------------------------------------------------------------------
# fused kernel:
#   real(iFFT2(x)) -> per-(b,c) min/max normalize -> FFT2 -> [identity fixed
#   point] -> real(iFFT2(.)), imaginary part forced to zero
# --------------------------------------------------------------------------
def _deq_fused_kernel(kr_ref, ki_ref, xr_ref, xi_ref, outr_ref, norm0_ref,
                      *, n_ch, inv_nn):
    kr = kr_ref[...]                              # (NN, NN) bf16
    ki = ki_ref[...]                              # (NN, NN) bf16
    xr = xr_ref[...].astype(jnp.bfloat16)         # (M, NN)
    xi = xi_ref[...].astype(jnp.bfloat16)         # (M, NN)

    # real part of the 2-D inverse DFT, unscaled: the positive 1/N^2 factor
    # (and the conj sign bookkeeping) cancels in the min/max normalization.
    real = (jnp.dot(xr, kr, preferred_element_type=jnp.float32)
            + jnp.dot(xi, ki, preferred_element_type=jnp.float32))

    # tensor_normlize: per-(batch, channel) min/max over the spatial plane.
    mx = jnp.max(real, axis=1, keepdims=True)
    mn = jnp.min(real, axis=1, keepdims=True)
    rng = mx - mn
    inv_rng = pl.reciprocal(jnp.where(rng > 0.0, rng, 1.0), approx=True)
    norm = (real - mn) * inv_rng                  # (M, NN) f32

    # n_ipt_periter = normalized real plane of batch 0 only (rows 0..C-1).
    norm0_ref[...] = norm[:n_ch]

    # forward 2-D DFT of (norm + 0j)
    nb = norm.astype(jnp.bfloat16)
    fftr = jnp.dot(nb, kr, preferred_element_type=jnp.float32)
    ffti = jnp.dot(nb, ki, preferred_element_type=jnp.float32)

    # TODO(synk): the externally-injected solver_img / denoiser self.f (and the
    # randperm measurement subsampling + backward hook) operate on (fftr, ffti)
    # here; with no self-contained definition the fixed point is identity.
    zr = fftr.astype(jnp.bfloat16)
    zi = ffti.astype(jnp.bfloat16)

    # final iFFT2 real part, 1/N^2 applied as a VPU multiply; imag := 0 is
    # produced for free in the wrapper (all-zero plane).
    outr_ref[...] = (jnp.dot(zr, kr, preferred_element_type=jnp.float32)
                     + jnp.dot(zi, ki, preferred_element_type=jnp.float32)) * inv_nn


def _deq_fused(kr, ki, xr, xi, n_ch):
    M, NN = xr.shape
    # Grid-less call: whole arrays are copied into VMEM once (constant DFT
    # matrices are single-buffered), the kernel runs once over the folded
    # (B*C, NN) problem.
    return pl.pallas_call(
        functools.partial(_deq_fused_kernel, n_ch=n_ch, inv_nn=1.0 / NN),
        out_shape=(jax.ShapeDtypeStruct((M, NN), jnp.float32),     # real(iFFT(z))
                   jax.ShapeDtypeStruct((n_ch, NN), jnp.float32)),  # norm, batch 0
    )(kr, ki, xr, xi)


# --------------------------------------------------------------------------
# DEQFixedPoint.forward (inference semantics)
# --------------------------------------------------------------------------
def deq_fixed_point_forward(n_ipt, n_y=None, gt=None):
    """n_ipt: (B, C, H, W, 2) float32 (old torch.fft real/imag layout)."""
    B, C, H, W, two = n_ipt.shape
    assert two == 2 and H == W, "tensor_normlize requires square planes"
    NN = H * W
    M = B * C

    kr, ki = _kron_dft_matrices(H)

    xr = n_ipt[..., 0].reshape(M, NN)
    xi = n_ipt[..., 1].reshape(M, NN)

    outr, norm0 = _deq_fused(kr, ki, xr, xi, C)

    tauList, gammaList = None, None
    n_ipt_periter = norm0.reshape(C, H, W)        # n_ipt_real[0, :]

    # z[..., -1] = 0  (imaginary part forced to zero)
    z = jnp.stack([outr.reshape(B, C, H, W),
                   jnp.zeros((B, C, H, W), jnp.float32)], -1)
    return z, tauList, gammaList, n_ipt_periter


# --------------------------------------------------------------------------
if __name__ == "__main__":
    key = jax.random.PRNGKey(0)
    B, C, H, W = 2, 4, 16, 16
    n_ipt = jax.random.normal(key, (B, C, H, W, 2), dtype=jnp.float32)

    z, tau, gamma, periter = deq_fixed_point_forward(n_ipt)
    jax.block_until_ready(z)

    # silent numerical sanity check against a jnp.fft reference
    # (bf16 DFT weights + approx reciprocal => ~1e-2 absolute error budget
    #  at NN = 256, hence the 2e-2 tolerance)
    xc = n_ipt[..., 0] + 1j * n_ipt[..., 1]
    real = jnp.real(jnp.fft.ifft2(xc, axes=(-2, -1)))
    mx = real.max(axis=(-2, -1), keepdims=True)
    mn = real.min(axis=(-2, -1), keepdims=True)
    norm_ref = (real - mn) / (mx - mn)
    zc_ref = jnp.fft.ifft2(jnp.fft.fft2(norm_ref.astype(jnp.complex64),
                                        axes=(-2, -1)), axes=(-2, -1))
    z_ref = jnp.stack([jnp.real(zc_ref), jnp.zeros_like(real)], -1)
    assert jnp.allclose(z, z_ref, atol=2e-2), "z mismatch vs reference"
    assert jnp.allclose(periter, norm_ref[0], atol=2e-2), "periter mismatch"

    print("KERNEL_OK")
</pallas_src>

<mosaic_0001>
module attributes {stable_mosaic.version = 11 : i64} {
  func.func @_deq_fused_kernel(%arg0: memref<256x256xbf16, #tpu.memory_space<vmem>>, %arg1: memref<256x256xbf16, #tpu.memory_space<vmem>>, %arg2: memref<8x256xf32, #tpu.memory_space<vmem>>, %arg3: memref<8x256xf32, #tpu.memory_space<vmem>>, %arg4: memref<8x256xf32, #tpu.memory_space<vmem>>, %arg5: memref<4x256xf32, #tpu.memory_space<vmem>>) attributes {dimension_semantics = [], scalar_prefetch = 0 : i64, scratch_operands = 0 : i64, tpu.core_type = #tpu.core_type<tc>} {
    %c0 = arith.constant 0 : index
    %c0_0 = arith.constant 0 : index
    %0 = vector.load %arg0[%c0, %c0_0] : memref<256x256xbf16, #tpu.memory_space<vmem>>, vector<256x256xbf16>
    %c0_1 = arith.constant 0 : index
    %c0_2 = arith.constant 0 : index
    %1 = vector.load %arg1[%c0_1, %c0_2] : memref<256x256xbf16, #tpu.memory_space<vmem>>, vector<256x256xbf16>
    %c0_3 = arith.constant 0 : index
    %c0_4 = arith.constant 0 : index
    %2 = vector.load %arg2[%c0_3, %c0_4] : memref<8x256xf32, #tpu.memory_space<vmem>>, vector<8x256xf32>
    %3 = arith.truncf %2 : vector<8x256xf32> to vector<8x256xbf16>
    %c0_5 = arith.constant 0 : index
    %c0_6 = arith.constant 0 : index
    %4 = vector.load %arg3[%c0_5, %c0_6] : memref<8x256xf32, #tpu.memory_space<vmem>>, vector<8x256xf32>
    %5 = arith.truncf %4 : vector<8x256xf32> to vector<8x256xbf16>
    %cst = arith.constant dense<0.000000e+00> : vector<8x256xf32>
    %6 = tpu.matmul %3, %0, %cst {dimension_numbers = #tpu.dot_dimension_numbers<[1], [0], [0], [1], [0, 0, 1, 1], [], []>} : vector<8x256xbf16>, vector<256x256xbf16>, vector<8x256xf32> -> vector<8x256xf32>
    %cst_7 = arith.constant dense<0.000000e+00> : vector<8x256xf32>
    %7 = tpu.matmul %5, %1, %cst_7 {dimension_numbers = #tpu.dot_dimension_numbers<[1], [0], [0], [1], [0, 0, 1, 1], [], []>} : vector<8x256xbf16>, vector<256x256xbf16>, vector<8x256xf32> -> vector<8x256xf32>
    %8 = arith.addf %6, %7 : vector<8x256xf32>
    %cst_8 = arith.constant dense<0xFF800000> : vector<8xf32>
    %9 = vector.multi_reduction <maximumf>, %8, %cst_8 [1] : vector<8x256xf32> to vector<8xf32>
    %10 = vector.shape_cast %9 : vector<8xf32> to vector<8x1xf32>
    %cst_9 = arith.constant dense<0x7F800000> : vector<8xf32>
    %11 = vector.multi_reduction <minimumf>, %8, %cst_9 [1] : vector<8x256xf32> to vector<8xf32>
    %12 = vector.shape_cast %11 : vector<8xf32> to vector<8x1xf32>
    %13 = arith.subf %10, %12 : vector<8x1xf32>
    %cst_10 = arith.constant 0.000000e+00 : f32
    %14 = vector.broadcast %cst_10 : f32 to vector<8x1xf32>
    %15 = arith.cmpf ogt, %13, %14 : vector<8x1xf32>
    %cst_11 = arith.constant 1.000000e+00 : f32
    %16 = vector.broadcast %cst_11 : f32 to vector<8x1xf32>
    %17 = arith.select %15, %13, %16 : vector<8x1xi1>, vector<8x1xf32>
    %18 = tpu.reciprocal %17 {approx = true} : vector<8x1xf32> -> vector<8x1xf32>
    %19 = vector.broadcast %12 : vector<8x1xf32> to vector<8x256xf32>
    %20 = arith.subf %8, %19 : vector<8x256xf32>
    %21 = vector.broadcast %18 : vector<8x1xf32> to vector<8x256xf32>
    %22 = arith.mulf %20, %21 : vector<8x256xf32>
    %23 = vector.extract_strided_slice %22 {offsets = [0, 0], sizes = [4, 256], strides = [1, 1]} : vector<8x256xf32> to vector<4x256xf32>
    %c0_12 = arith.constant 0 : index
    %c0_13 = arith.constant 0 : index
    %24 = vector.load %arg5[%c0_12, %c0_13] : memref<4x256xf32, #tpu.memory_space<vmem>>, vector<4x256xf32>
    tpu.vector_store %arg5[%c0_12, %c0_13], %23 {strides = array<i32>} : memref<4x256xf32, #tpu.memory_space<vmem>>, vector<4x256xf32>,
    %25 = arith.truncf %22 : vector<8x256xf32> to vector<8x256xbf16>
    %cst_14 = arith.constant dense<0.000000e+00> : vector<8x256xf32>
    %26 = tpu.matmul %25, %0, %cst_14 {dimension_numbers = #tpu.dot_dimension_numbers<[1], [0], [0], [1], [0, 0, 1, 1], [], []>} : vector<8x256xbf16>, vector<256x256xbf16>, vector<8x256xf32> -> vector<8x256xf32>
    %cst_15 = arith.constant dense<0.000000e+00> : vector<8x256xf32>
    %27 = tpu.matmul %25, %1, %cst_15 {dimension_numbers = #tpu.dot_dimension_numbers<[1], [0], [0], [1], [0, 0, 1, 1], [], []>} : vector<8x256xbf16>, vector<256x256xbf16>, vector<8x256xf32> -> vector<8x256xf32>
    %28 = arith.truncf %26 : vector<8x256xf32> to vector<8x256xbf16>
    %29 = arith.truncf %27 : vector<8x256xf32> to vector<8x256xbf16>
    %cst_16 = arith.constant dense<0.000000e+00> : vector<8x256xf32>
    %30 = tpu.matmul %28, %0, %cst_16 {dimension_numbers = #tpu.dot_dimension_numbers<[1], [0], [0], [1], [0, 0, 1, 1], [], []>} : vector<8x256xbf16>, vector<256x256xbf16>, vector<8x256xf32> -> vector<8x256xf32>
    %cst_17 = arith.constant dense<0.000000e+00> : vector<8x256xf32>
    %31 = tpu.matmul %29, %1, %cst_17 {dimension_numbers = #tpu.dot_dimension_numbers<[1], [0], [0], [1], [0, 0, 1, 1], [], []>} : vector<8x256xbf16>, vector<256x256xbf16>, vector<8x256xf32> -> vector<8x256xf32>
    %32 = arith.addf %30, %31 : vector<8x256xf32>
    %cst_18 = arith.constant 3.906250e-03 : f32
    %33 = vector.broadcast %cst_18 : f32 to vector<8x256xf32>
    %34 = arith.mulf %32, %33 : vector<8x256xf32>
    %c0_19 = arith.constant 0 : index
    %c0_20 = arith.constant 0 : index
    %35 = vector.load %arg4[%c0_19, %c0_20] : memref<8x256xf32, #tpu.memory_space<vmem>>, vector<8x256xf32>
    tpu.vector_store %arg4[%c0_19, %c0_20], %34 {strides = array<i32>} : memref<8x256xf32, #tpu.memory_space<vmem>>, vector<8x256xf32>,
    return
  }
}

</mosaic_0001>

<bundles_post_ra>
// kernel: tpu_custom_call.1
= control target key start
LH: loop header
LB: loop body
LE: loop exit
PB: predicated region body
PF: predicated region fallthrough
CT: control target
= control target key end

     0   :  { %11 = vsyncpa [#allocation3], 0  ;;  %s1525_s0 = inlined_call_operand.hbm [shape: bf16[256,256], index: 0, kind: input, shape index: {}]   ;;  %s1526_s1 = inlined_call_operand.hbm [shape: bf16[256,256], index: 1, kind: input, shape index: {}]   ;;  %s1527_s2 = inlined_call_operand.hbm [shape: f32[8,256], index: 2, kind: input, shape index: {}]   ;;  %s1528_s3 = inlined_call_operand.hbm [shape: f32[8,256], index: 3, kind: input, shape index: {}]   ;;  %s1529_s4 = inlined_call_operand.hbm [shape: f32[8,256], index: 4, kind: output, shape index: {0}]   ;;  %s1530_s5 = inlined_call_operand.hbm [shape: f32[4,256], index: 5, kind: output, shape index: {1}]  }
   0x1   :  { %12 = vsyncpa [#allocation6], 0 }
   0x2   :  { %13 = vsyncpa [#allocation9], 0 }
   0x3   :  { %14 = vsyncpa [#allocation4], 0 }
   0x4   :  { %15 = vsyncpa [#allocation12], 0  ;;  %s1088_s18 = smov [#allocation5]   ;;  %s1089_s20 = smov [#allocation2]  }
   0x5   :  { %s33_s19 = sshll.u32 %s1088_s18, 4  ;;  %s21_s21 = sshll.u32 %s1089_s20, 4  ;;  %s34_s19 = int_to_ptr.vmem [resolvable:$true] %s33_s19  ;;  %s1126_s21 = int_to_ptr.vmem [resolvable:$true] %s21_s21 }
   0x6   :  { %s946_s24 = scalar_lea.hbm %s1526_s1, 4096 }
   0x7   :  { %p947_p0 = scmp.ne.s32.totalorder %s1526_s1, %s946_s24  ;;  %p950_p1 = scmp.lt.u32.totalorder %s946_s24, %s1526_s1 }
   0x9   :  { %p952_p2 = pnand %p950_p1, %p947_p0 }
   0xb   :  { %955 = shalt.err (!%p952_p2)
}
   0xc   :  { %s956_s29 = scalar_lea.vmem %s34_s19, 4096  ;;  %p961_p4 = scmp.lt.s32.totalorder %s34_s19, %s34_s19 }
   0xd   :  { %p957_p3 = scmp.ne.s32.totalorder %s34_s19, %s956_s29  ;;  %p962_p5 = scmp.lt.s32.totalorder %s956_s29, %s956_s29 }
   0xf   :  { %p963_p6 = por %p962_p5, %p961_p4 }
  0x11   :  { %p964_p7 = pnand %p963_p6, %p957_p3 }
  0x13   :  { %967 = shalt.err (!%p964_p7)
}
  0x14   :  { %s1090_s30 = smov 128   ;;  %s1091_s6 = smov 8  }
  0x15   :  { %39 = dma.hbm_to_vmem [thread:$0]  %s1526_s1, 4096, %s34_s19, [#allocation6], %s1090_s30, %s1090_s30, %s1091_s6  }
  0x16   :  { %s968_s11 = scalar_lea.hbm %s1525_s0, 4096 }
  0x17   :  { %p969_p8 = scmp.ne.s32.totalorder %s1525_s0, %s968_s11  ;;  %p972_p9 = scmp.lt.u32.totalorder %s968_s11, %s1525_s0 }
  0x19   :  { %p974_p10 = pnand %p972_p9, %p969_p8 }
  0x1b   :  { %977 = shalt.err (!%p974_p10)
}
  0x1c   :  { %s978_s16 = scalar_lea.vmem %s1126_s21, 4096  ;;  %p983_p12 = scmp.lt.s32.totalorder %s1126_s21, %s1126_s21 }
  0x1d   :  { %p979_p11 = scmp.ne.s32.totalorder %s1126_s21, %s978_s16  ;;  %p984_p13 = scmp.lt.s32.totalorder %s978_s16, %s978_s16 }
  0x1f   :  { %p985_p0 = por %p984_p13, %p983_p12 }
  0x21   :  { %p986_p1 = pnand %p985_p0, %p979_p11 }
  0x23   :  { %989 = shalt.err (!%p986_p1)
}
  0x24   :  { %27 = dma.hbm_to_vmem [thread:$0]  %s1525_s0, 4096, %s1126_s21, [#allocation3], %s1090_s30, %s1090_s30, %s1091_s6  }
  0x25   :  { %s1092_s18 = smov [#allocation7]   ;;  %s1093_s20 = smov [#allocation8]  }
  0x26   :  { %s46_s19 = sshll.u32 %s1092_s18, 4  ;;  %s56_s22 = sshll.u32 %s1093_s20, 4  ;;  %s47_s19 = int_to_ptr.vmem [resolvable:$true] %s46_s19  ;;  %s57_s22 = int_to_ptr.vmem [resolvable:$true] %s56_s22 }
  0x27   :  { %s990_s25 = scalar_lea.hbm %s1527_s2, 256 }
  0x28   :  { %p991_p2 = scmp.ne.s32.totalorder %s1527_s2, %s990_s25  ;;  %p994_p3 = scmp.lt.u32.totalorder %s990_s25, %s1527_s2 }
  0x2a   :  { %p996_p4 = pnand %p994_p3, %p991_p2 }
  0x2c   :  { %999 = shalt.err (!%p996_p4)
}
  0x2d   :  { %s1000_s0 = scalar_lea.vmem %s47_s19, 256  ;;  %p1005_p6 = scmp.lt.s32.totalorder %s47_s19, %s47_s19 }
  0x2e   :  { %p1001_p5 = scmp.ne.s32.totalorder %s47_s19, %s1000_s0  ;;  %p1006_p7 = scmp.lt.s32.totalorder %s1000_s0, %s1000_s0 }
  0x30   :  { %p1007_p8 = por %p1006_p7, %p1005_p6 }
  0x32   :  { %p1008_p9 = pnand %p1007_p8, %p1001_p5 }
  0x34   :  { %1011 = shalt.err (!%p1008_p9)
}
  0x35   :  { %49 = dma.hbm_to_vmem [thread:$0]  %s1527_s2, 256, %s47_s19, [#allocation6]  }
  0x36   :  { %s1012_s8 = scalar_lea.hbm %s1528_s3, 256 }
  0x37   :  { %p1013_p10 = scmp.ne.s32.totalorder %s1528_s3, %s1012_s8  ;;  %p1016_p11 = scmp.lt.u32.totalorder %s1012_s8, %s1528_s3 }
  0x39   :  { %p1018_p12 = pnand %p1016_p11, %p1013_p10 }
  0x3b   :  { %1021 = shalt.err (!%p1018_p12)
}
  0x3c   :  { %s1022_s13 = scalar_lea.vmem %s57_s22, 256  ;;  %p1027_p0 = scmp.lt.s32.totalorder %s57_s22, %s57_s22 }
  0x3d   :  { %p1023_p13 = scmp.ne.s32.totalorder %s57_s22, %s1022_s13  ;;  %p1028_p1 = scmp.lt.s32.totalorder %s1022_s13, %s1022_s13 }
  0x3f   :  { %p1029_p2 = por %p1028_p1, %p1027_p0 }
  0x41   :  { %p1030_p3 = pnand %p1029_p2, %p1023_p13 }
  0x43   :  { %1033 = shalt.err (!%p1030_p3)
}
  0x44   :  { %59 = dma.hbm_to_vmem [thread:$0]  %s1528_s3, 256, %s57_s22, [#allocation9]  }
  0x45   :  { %1078 = dma.done.wait [#allocation3], 4096  }
  0x46   :  { %1079 = vsyncadd [#allocation3], 4294963200 }
  0x47   :  { %1080 = dma.done.wait [#allocation6], 4352  }
  0x48   :  { %1081 = vsyncadd [#allocation6], 4294962944 }
  0x49   :  { %1082 = dma.done.wait [#allocation9], 256  }
  0x4a   :  { %1083 = vsyncadd [#allocation9], 4294967040  ;;  %v1181_v0 = vld [vmem:[#allocation5 + $0x4] ss:$8 sps:$4 sm:$0xff]   ;;  %v1186_v2 = vld [vmem:[#allocation5] ss:$8 sps:$4 sm:$0xff]  }
  0x4b   :  { %v1183_v1 = vld [vmem:[#allocation2 + $0x4] ss:$8 sps:$4 sm:$0xff]   ;;  %304 = vmatprep.subr.bf16.mxu1 %v1181_v0  ;;  %v1188_v3 = vld [vmem:[#allocation2] ss:$8 sps:$4 sm:$0xff]   ;;  %v1191_v4 = vld [vmem:[#allocation5 + $0x14] ss:$8 sps:$4 sm:$0xff]  }
  0x4c   :  { %505 = vmatprep.subr.bf16.mxu0 %v1183_v1  ;;  %305 = vmatpush1.bf16.msra.mxu1 %v1186_v2  ;;  %v1195_v5 = vld [vmem:[#allocation2 + $0x14] ss:$8 sps:$4 sm:$0xff]   ;;  %v1197_v6 = vld [vmem:[#allocation5 + $0x10] ss:$8 sps:$4 sm:$0xff]   ;;  %v1203_v8 = vld [vmem:[#allocation5 + $0x24] ss:$8 sps:$4 sm:$0xff]  }
  0x4d   :  { %506 = vmatpush1.bf16.msra.mxu0 %v1188_v3  ;;  %306 = vmatprep.subr.bf16.mxu1 %v1191_v4  ;;  %v1200_v7 = vld [vmem:[#allocation2 + $0x10] ss:$8 sps:$4 sm:$0xff]   ;;  %v1205_v9 = vld [vmem:[#allocation2 + $0x24] ss:$8 sps:$4 sm:$0xff]   ;;  %v1207_v10 = vld [vmem:[#allocation5 + $0x20] ss:$8 sps:$4 sm:$0xff]  }
  0x4e   :  { %507 = vmatprep.subr.bf16.mxu0 %v1195_v5  ;;  %v1209_v11 = vld [vmem:[#allocation2 + $0x20] ss:$8 sps:$4 sm:$0xff]   ;;  %v1213_v12 = vld [vmem:[#allocation5 + $0x34] ss:$8 sps:$4 sm:$0xff]   ;;  %v1219_v14 = vld [vmem:[#allocation5 + $0x30] ss:$8 sps:$4 sm:$0xff]  }
  0x4f   :  { %v1217_v13 = vld [vmem:[#allocation2 + $0x34] ss:$8 sps:$4 sm:$0xff]   ;;  %v1223_v15 = vld [vmem:[#allocation2 + $0x30] ss:$8 sps:$4 sm:$0xff]   ;;  %v1225_v16 = vld [vmem:[#allocation5 + $0x44] ss:$8 sps:$4 sm:$0xff]  }
  0x50   :  { %307 = vmatpush1.bf16.msra.mxu1 %v1197_v6  ;;  %v1229_v17 = vld [vmem:[#allocation2 + $0x44] ss:$8 sps:$4 sm:$0xff]   ;;  %v1231_v18 = vld [vmem:[#allocation5 + $0x40] ss:$8 sps:$4 sm:$0xff]   ;;  %v1237_v20 = vld [vmem:[#allocation5 + $0x54] ss:$8 sps:$4 sm:$0xff]  }
  0x51   :  { %508 = vmatpush1.bf16.msra.mxu0 %v1200_v7  ;;  %308 = vmatprep.subr.bf16.mxu1 %v1203_v8  ;;  %v1233_v19 = vld [vmem:[#allocation2 + $0x40] ss:$8 sps:$4 sm:$0xff]   ;;  %v1241_v21 = vld [vmem:[#allocation2 + $0x54] ss:$8 sps:$4 sm:$0xff]   ;;  %v1243_v22 = vld [vmem:[#allocation5 + $0x50] ss:$8 sps:$4 sm:$0xff]  }
  0x52   :  { %509 = vmatprep.subr.bf16.mxu0 %v1205_v9  ;;  %v1247_v23 = vld [vmem:[#allocation2 + $0x50] ss:$8 sps:$4 sm:$0xff]   ;;  %v1249_v24 = vld [vmem:[#allocation5 + $0x64] ss:$8 sps:$4 sm:$0xff]   ;;  %v1255_v26 = vld [vmem:[#allocation5 + $0x60] ss:$8 sps:$4 sm:$0xff]  }
  0x53   :  { %v1253_v25 = vld [vmem:[#allocation2 + $0x64] ss:$8 sps:$4 sm:$0xff]   ;;  %v1257_v27 = vld [vmem:[#allocation2 + $0x60] ss:$8 sps:$4 sm:$0xff]   ;;  %v1261_v28 = vld [vmem:[#allocation5 + $0x74] ss:$8 sps:$4 sm:$0xff]  }
  0x54   :  { %309 = vmatpush1.bf16.msra.mxu1 %v1207_v10  ;;  %v1265_v29 = vld [vmem:[#allocation2 + $0x74] ss:$8 sps:$4 sm:$0xff]   ;;  %v1267_v30 = vld [vmem:[#allocation5 + $0x70] ss:$8 sps:$4 sm:$0xff]   ;;  %v1273_v32 = vld [vmem:[#allocation5 + $0x84] ss:$8 sps:$4 sm:$0xff]  }
  0x55   :  { %510 = vmatpush1.bf16.msra.mxu0 %v1209_v11  ;;  %310 = vmatprep.subr.bf16.mxu1 %v1213_v12  ;;  %v1271_v31 = vld [vmem:[#allocation2 + $0x70] ss:$8 sps:$4 sm:$0xff]   ;;  %v1277_v33 = vld [vmem:[#allocation2 + $0x84] ss:$8 sps:$4 sm:$0xff]   ;;  %v1279_v34 = vld [vmem:[#allocation5 + $0x80] ss:$8 sps:$4 sm:$0xff]  }
  0x56   :  { %511 = vmatprep.subr.bf16.mxu0 %v1217_v13  ;;  %1554 = vst [vmem:[#allocation18_spill] sm:$0xff] %v1271_v31  ;;  %1555 = vst [vmem:[#allocation19_spill] sm:$0xff] %v1277_v33  ;;  %v1281_v35 = vld [vmem:[#allocation2 + $0x80] ss:$8 sps:$4 sm:$0xff]   ;;  %v1285_v36 = vld [vmem:[#allocation5 + $0x94] ss:$8 sps:$4 sm:$0xff]  }
  0x57   :  { %1556 = vst [vmem:[#allocation20_spill] sm:$0xff] %v1281_v35  ;;  %v1289_v37 = vld [vmem:[#allocation2 + $0x94] ss:$8 sps:$4 sm:$0xff]   ;;  %v1291_v38 = vld [vmem:[#allocation5 + $0x90] ss:$8 sps:$4 sm:$0xff]   ;;  %v137_v48 = vld [vmem:[#allocation7 + $0x8] sm:$0xff] }
  0x58   :  { %311 = vmatpush1.bf16.msra.mxu1 %v1219_v14  ;;  %1557 = vst [vmem:[#allocation21_spill] sm:$0xff] %v1289_v37  ;;  %v1295_v39 = vld [vmem:[#allocation2 + $0x90] ss:$8 sps:$4 sm:$0xff]   ;;  %v1297_v40 = vld [vmem:[#allocation5 + $0xa4] ss:$8 sps:$4 sm:$0xff]   ;;  %v139_v51 = vpack.c.bf16 %v137_v48, %v137_v48  ;;  %s1094_s3 = smov [#allocation11]  }
  0x59   :  { %512 = vmatpush1.bf16.msra.mxu0 %v1223_v15  ;;  %312 = vmatprep.subr.bf16.mxu1 %v1225_v16  ;;  %1558 = vst [vmem:[#allocation22_spill] sm:$0xff] %v1295_v39  ;;  %v1301_v41 = vld [vmem:[#allocation2 + $0xa4] ss:$8 sps:$4 sm:$0xff]   ;;  %v1303_v42 = vld [vmem:[#allocation5 + $0xa0] ss:$8 sps:$4 sm:$0xff]   ;;  %v141_v46 = vld [vmem:[#allocation8 + $0x8] sm:$0xff] }
  0x5a   :  { %513 = vmatprep.subr.bf16.mxu0 %v1229_v17  ;;  %1559 = vst [vmem:[#allocation23_spill] sm:$0xff] %v1301_v41  ;;  %v1305_v43 = vld [vmem:[#allocation2 + $0xa0] ss:$8 sps:$4 sm:$0xff]   ;;  %v1309_v44 = vld [vmem:[#allocation5 + $0xb4] ss:$8 sps:$4 sm:$0xff]   ;;  %v143_v47 = vpack.c.bf16 %v141_v46, %v141_v46  ;;  %537 = vmatprep.mubr.bf16.mxu0 %v139_v51  ;;  %s755_s15 = sshll.u32 %s1094_s3, 4  ;;  %s756_s15 = int_to_ptr.vmem [resolvable:$true] %s755_s15 }
  0x5b   :  { %1560 = vst [vmem:[#allocation24_spill] sm:$0xff] %v1305_v43  ;;  %v1313_v45 = vld [vmem:[#allocation2 + $0xb4] ss:$8 sps:$4 sm:$0xff]   ;;  %v1317_v49 = vld [vmem:[#allocation5 + $0xb0] ss:$8 sps:$4 sm:$0xff]   ;;  %s1034_s16 = scalar_lea.vmem %s756_s15, 128  ;;  %p1039_p5 = scmp.lt.s32.totalorder %s756_s15, %s756_s15 }
  0x5c   :  { %313 = vmatpush1.bf16.msra.mxu1 %v1231_v18  ;;  %1561 = vst [vmem:[#allocation25_spill] sm:$0xff] %v1313_v45  ;;  %v1319_v50 = vld [vmem:[#allocation2 + $0xb0] ss:$8 sps:$4 sm:$0xff]   ;;  %v1323_v52 = vld [vmem:[#allocation5 + $0xc4] ss:$8 sps:$4 sm:$0xff]   ;;  %336 = vmatprep.mubr.bf16.mxu1 %v143_v47  ;;  %p1035_p4 = scmp.ne.s32.totalorder %s756_s15, %s1034_s16  ;;  %p1040_p6 = scmp.lt.s32.totalorder %s1034_s16, %s1034_s16 }
  0x5d   :  { %514 = vmatpush1.bf16.msra.mxu0 %v1233_v19  ;;  %314 = vmatprep.subr.bf16.mxu1 %v1237_v20  ;;  %1562 = vst [vmem:[#allocation26_spill] sm:$0xff] %v1319_v50  ;;  %v1325_v53 = vld [vmem:[#allocation2 + $0xc4] ss:$8 sps:$4 sm:$0xff]   ;;  %v1329_v54 = vld [vmem:[#allocation5 + $0xc0] ss:$8 sps:$4 sm:$0xff]  }
  0x5e   :  { %515 = vmatprep.subr.bf16.mxu0 %v1241_v21  ;;  %1563 = vst [vmem:[#allocation27_spill] sm:$0xff] %v1325_v53  ;;  %v1331_v55 = vld [vmem:[#allocation2 + $0xc0] ss:$8 sps:$4 sm:$0xff]   ;;  %v1335_v56 = vld [vmem:[#allocation5 + $0xd4] ss:$8 sps:$4 sm:$0xff]   ;;  %p1041_p7 = por %p1040_p6, %p1039_p5 }
  0x5f   :  { %1564 = vst [vmem:[#allocation28_spill] sm:$0xff] %v1331_v55  ;;  %v1337_v57 = vld [vmem:[#allocation2 + $0xd4] ss:$8 sps:$4 sm:$0xff]   ;;  %v1341_v58 = vld [vmem:[#allocation5 + $0xd0] ss:$8 sps:$4 sm:$0xff]  }
  0x60   :  { %315 = vmatpush1.bf16.msra.mxu1 %v1243_v22  ;;  %1565 = vst [vmem:[#allocation29_spill] sm:$0xff] %v1337_v57  ;;  %1566 = vst [vmem:[#allocation30_spill] sm:$0xff] %v1341_v58  ;;  %v1343_v59 = vld [vmem:[#allocation2 + $0xd0] ss:$8 sps:$4 sm:$0xff]   ;;  %v1347_v60 = vld [vmem:[#allocation5 + $0xe4] ss:$8 sps:$4 sm:$0xff]   ;;  %p1042_p8 = pnand %p1041_p7, %p1035_p4 }
  0x61   :  { %516 = vmatpush1.bf16.msra.mxu0 %v1247_v23  ;;  %316 = vmatprep.subr.bf16.mxu1 %v1249_v24  ;;  %1567 = vst [vmem:[#allocation31_spill] sm:$0xff] %v1343_v59  ;;  %1568 = vst [vmem:[#allocation32_spill] sm:$0xff] %v1347_v60  ;;  %v1349_v61 = vld [vmem:[#allocation2 + $0xe4] ss:$8 sps:$4 sm:$0xff]   ;;  %v1353_v62 = vld [vmem:[#allocation5 + $0xe0] ss:$8 sps:$4 sm:$0xff]  }
  0x62   :  { %517 = vmatprep.subr.bf16.mxu0 %v1253_v25  ;;  %1569 = vst [vmem:[#allocation33_spill] sm:$0xff] %v1349_v61  ;;  %v1355_v63 = vld [vmem:[#allocation2 + $0xe0] ss:$8 sps:$4 sm:$0xff]   ;;  %v1359_v46 = vld [vmem:[#allocation5 + $0xf4] ss:$8 sps:$4 sm:$0xff]  }
  0x63   :  { %1570 = vst [vmem:[#allocation34_spill] sm:$0xff] %v1355_v63  ;;  %v1361_v47 = vld [vmem:[#allocation2 + $0xf4] ss:$8 sps:$4 sm:$0xff]   ;;  %v1363_v48 = vld [vmem:[#allocation5 + $0xf0] ss:$8 sps:$4 sm:$0xff]  }
  0x64   :  { %317 = vmatpush1.bf16.msra.mxu1 %v1255_v26  ;;  %1571 = vst [vmem:[#allocation35_spill] sm:$0xff] %v1361_v47  ;;  %v1367_v51 = vld [vmem:[#allocation2 + $0xf0] ss:$8 sps:$4 sm:$0xff]  }
  0x65   :  { %518 = vmatpush1.bf16.msra.mxu0 %v1257_v27  ;;  %318 = vmatprep.subr.bf16.mxu1 %v1261_v28  ;;  %1572 = vst [vmem:[#allocation36_spill] sm:$0xff] %v1367_v51 }
  0x66   :  { %519 = vmatprep.subr.bf16.mxu0 %v1265_v29 }
  0x68   :  { %319 = vmatpush1.bf16.msra.mxu1 %v1267_v30 }
  0x69   :  { %520 = vmatpush1.bf16.msra.mxu0 %v1271_v31  ;;  %320 = vmatprep.subr.bf16.mxu1 %v1273_v32 }
  0x6a   :  { %521 = vmatprep.subr.bf16.mxu0 %v1277_v33 }
  0x6c   :  { %321 = vmatpush1.bf16.msra.mxu1 %v1279_v34 }
  0x6d   :  { %522 = vmatpush1.bf16.msra.mxu0 %v1281_v35  ;;  %322 = vmatprep.subr.bf16.mxu1 %v1285_v36 }
  0x6e   :  { %523 = vmatprep.subr.bf16.mxu0 %v1289_v37 }
  0x70   :  { %323 = vmatpush1.bf16.msra.mxu1 %v1291_v38 }
  0x71   :  { %524 = vmatpush1.bf16.msra.mxu0 %v1295_v39  ;;  %324 = vmatprep.subr.bf16.mxu1 %v1297_v40 }
  0x72   :  { %525 = vmatprep.subr.bf16.mxu0 %v1301_v41 }
  0x74   :  { %325 = vmatpush1.bf16.msra.mxu1 %v1303_v42 }
  0x75   :  { %526 = vmatpush1.bf16.msra.mxu0 %v1305_v43  ;;  %326 = vmatprep.subr.bf16.mxu1 %v1309_v44 }
  0x76   :  { %527 = vmatprep.subr.bf16.mxu0 %v1313_v45 }
  0x78   :  { %327 = vmatpush1.bf16.msra.mxu1 %v1317_v49 }
  0x79   :  { %528 = vmatpush1.bf16.msra.mxu0 %v1319_v50  ;;  %328 = vmatprep.subr.bf16.mxu1 %v1323_v52 }
  0x7a   :  { %529 = vmatprep.subr.bf16.mxu0 %v1325_v53 }
  0x7c   :  { %329 = vmatpush1.bf16.msra.mxu1 %v1329_v54 }
  0x7d   :  { %530 = vmatpush1.bf16.msra.mxu0 %v1331_v55  ;;  %330 = vmatprep.subr.bf16.mxu1 %v1335_v56 }
  0x7e   :  { %531 = vmatprep.subr.bf16.mxu0 %v1337_v57 }
  0x80   :  { %331 = vmatpush1.bf16.msra.mxu1 %v1341_v58  ;;  %v140_v58 = vld [vmem:[#allocation8] sm:$0xff] }
  0x81   :  { %532 = vmatpush1.bf16.msra.mxu0 %v1343_v59  ;;  %332 = vmatprep.subr.bf16.mxu1 %v1347_v60  ;;  %v136_v59 = vld [vmem:[#allocation7] sm:$0xff]  ;;  %v142_v60 = vpack.c.bf16 %v140_v58, %v140_v58 }
  0x82   :  { %533 = vmatprep.subr.bf16.mxu0 %v1349_v61  ;;  %v138_v61 = vpack.c.bf16 %v136_v59, %v136_v59  ;;  %v1573_v58 = vld [vmem:[#allocation31_spill] sm:$0xff]  ;;  %v1574_v59 = vld [vmem:[#allocation30_spill] sm:$0xff] }
  0x84   :  { %333 = vmatpush1.bf16.msra.mxu1 %v1353_v62 }
  0x85   :  { %534 = vmatpush1.bf16.msra.mxu0 %v1355_v63  ;;  %334 = vmatprep.subr.bf16.mxu1 %v1359_v46 }
  0x86   :  { %535 = vmatprep.subr.bf16.mxu0 %v1361_v47 }
  0x88   :  { %335 = vmatpush1.bf16.msra.mxu1 %v1363_v48 }
  0x89   :  { %536 = vmatpush1.bf16.msra.mxu0 %v1367_v51  ;;  %567 = vmatprep.subr.bf16.mxu1 %v1183_v1 }
  0x8a   :  { %653 = vmatprep.subr.bf16.mxu0 %v1181_v0 }
  0x8b   :  { %337 = vmatmul.mubr.bf16.vlgmr.msra.gmra.mrb[0].mxu1 %v142_v60  ;;  %v1575_v60 = vld [vmem:[#allocation33_spill] sm:$0xff] }
  0x8c   :  { %538 = vmatmul.mubr.bf16.vlgmr.msra.gmra.mrb[0].mxu0 %v138_v61  ;;  %568 = vmatpush1.bf16.msra.mxu1 %v1188_v3  ;;  %v1576_v61 = vld [vmem:[#allocation32_spill] sm:$0xff] }
  0x8d   :  { %654 = vmatpush1.bf16.msra.mxu0 %v1186_v2  ;;  %569 = vmatprep.subr.bf16.mxu1 %v1195_v5 }
  0x8e   :  { %655 = vmatprep.subr.bf16.mxu0 %v1191_v4 }
  0x90   :  { %570 = vmatpush1.bf16.msra.mxu1 %v1200_v7 }
  0x91   :  { %656 = vmatpush1.bf16.msra.mxu0 %v1197_v6  ;;  %571 = vmatprep.subr.bf16.mxu1 %v1205_v9 }
  0x92   :  { %657 = vmatprep.subr.bf16.mxu0 %v1203_v8 }
  0x94   :  { %572 = vmatpush1.bf16.msra.mxu1 %v1209_v11 }
  0x95   :  { %658 = vmatpush1.bf16.msra.mxu0 %v1207_v10  ;;  %573 = vmatprep.subr.bf16.mxu1 %v1217_v13 }
  0x96   :  { %659 = vmatprep.subr.bf16.mxu0 %v1213_v12 }
  0x98   :  { %574 = vmatpush1.bf16.msra.mxu1 %v1223_v15 }
  0x99   :  { %660 = vmatpush1.bf16.msra.mxu0 %v1219_v14  ;;  %575 = vmatprep.subr.bf16.mxu1 %v1229_v17 }
  0x9a   :  { %661 = vmatprep.subr.bf16.mxu0 %v1225_v16 }
  0x9c   :  { %576 = vmatpush1.bf16.msra.mxu1 %v1233_v19 }
  0x9d   :  { %662 = vmatpush1.bf16.msra.mxu0 %v1231_v18  ;;  %577 = vmatprep.subr.bf16.mxu1 %v1241_v21 }
  0x9e   :  { %663 = vmatprep.subr.bf16.mxu0 %v1237_v20 }
  0xa0   :  { %578 = vmatpush1.bf16.msra.mxu1 %v1247_v23 }
  0xa1   :  { %664 = vmatpush1.bf16.msra.mxu0 %v1243_v22  ;;  %579 = vmatprep.subr.bf16.mxu1 %v1253_v25 }
  0xa2   :  { %665 = vmatprep.subr.bf16.mxu0 %v1249_v24 }
  0xa4   :  { %580 = vmatpush1.bf16.msra.mxu1 %v1257_v27 }
  0xa5   :  { %666 = vmatpush1.bf16.msra.mxu0 %v1255_v26  ;;  %581 = vmatprep.subr.bf16.mxu1 %v1265_v29 }
  0xa6   :  { %667 = vmatprep.subr.bf16.mxu0 %v1261_v28 }
  0xa8   :  { %582 = vmatpush1.bf16.msra.mxu1 %v1271_v31 }
  0xa9   :  { %668 = vmatpush1.bf16.msra.mxu0 %v1267_v30  ;;  %583 = vmatprep.subr.bf16.mxu1 %v1277_v33 }
  0xaa   :  { %669 = vmatprep.subr.bf16.mxu0 %v1273_v32 }
  0xac   :  { %584 = vmatpush1.bf16.msra.mxu1 %v1281_v35 }
  0xad   :  { %670 = vmatpush1.bf16.msra.mxu0 %v1279_v34  ;;  %585 = vmatprep.subr.bf16.mxu1 %v1289_v37 }
  0xae   :  { %671 = vmatprep.subr.bf16.mxu0 %v1285_v36 }
  0xb0   :  { %586 = vmatpush1.bf16.msra.mxu1 %v1295_v39 }
  0xb1   :  { %672 = vmatpush1.bf16.msra.mxu0 %v1291_v38  ;;  %587 = vmatprep.subr.bf16.mxu1 %v1301_v41 }
  0xb2   :  { %673 = vmatprep.subr.bf16.mxu0 %v1297_v40 }
  0xb4   :  { %588 = vmatpush1.bf16.msra.mxu1 %v1305_v43 }
  0xb5   :  { %674 = vmatpush1.bf16.msra.mxu0 %v1303_v42  ;;  %589 = vmatprep.subr.bf16.mxu1 %v1313_v45 }
  0xb6   :  { %675 = vmatprep.subr.bf16.mxu0 %v1309_v44 }
  0xb8   :  { %590 = vmatpush1.bf16.msra.mxu1 %v1319_v50 }
  0xb9   :  { %676 = vmatpush1.bf16.msra.mxu0 %v1317_v49  ;;  %591 = vmatprep.subr.bf16.mxu1 %v1325_v53 }
  0xba   :  { %677 = vmatprep.subr.bf16.mxu0 %v1323_v52 }
  0xbc   :  { %592 = vmatpush1.bf16.msra.mxu1 %v1331_v55 }
  0xbd   :  { %678 = vmatpush1.bf16.msra.mxu0 %v1329_v54  ;;  %593 = vmatprep.subr.bf16.mxu1 %v1337_v57 }
  0xbe   :  { %679 = vmatprep.subr.bf16.mxu0 %v1335_v56 }
  0xc0   :  { %594 = vmatpush1.bf16.msra.mxu1 %v1573_v58 }
  0xc1   :  { %680 = vmatpush1.bf16.msra.mxu0 %v1574_v59  ;;  %595 = vmatprep.subr.bf16.mxu1 %v1575_v60 }
  0xc2   :  { %681 = vmatprep.subr.bf16.mxu0 %v1576_v61 }
  0xc4   :  { %596 = vmatpush1.bf16.msra.mxu1 %v1355_v63 }
  0xc5   :  { %682 = vmatpush1.bf16.msra.mxu0 %v1353_v62  ;;  %597 = vmatprep.subr.bf16.mxu1 %v1361_v47 }
  0xc6   :  { %683 = vmatprep.subr.bf16.mxu0 %v1359_v46 }
  0xc8   :  { %598 = vmatpush1.bf16.msra.mxu1 %v1367_v51 }
  0xc9   :  { %684 = vmatpush1.bf16.msra.mxu0 %v1363_v48  ;;  %608 = vmatprep.subr.bf16.mxu1 %v1181_v0 }
  0xca   :  { %694 = vmatprep.subr.bf16.mxu0 %v1183_v1 }
 0x15e   :  { %v338_v58 = vpop.f32.mrb[0].mxu1 }
 0x15f   :  { %v539_v60 = vpop.f32.mrb[0].mxu0  ;;  %v340_v55 = vpop.f32.mrb[1].mxu1 }
 0x160   :  { %v540_v57 = vadd.f32 %v539_v60, %v338_v58  ;;  %v541_v53 = vpop.f32.mrb[1].mxu0  ;;  %v342_v50 = vpop.f32.mrb[2].mxu1 }
 0x161   :  { %v542_v63 = vadd.f32 %v541_v53, %v340_v55  ;;  %v543_v45 = vpop.f32.mrb[2].mxu0  ;;  %v343_v43 = vpop.f32.mrb[3].mxu1 }
 0x162   :  { %v544_v47 = vpop.f32.mrb[3].mxu0 }
 0x163   :  { %v546_v41 = vmax.f32 %v540_v57, %v542_v63  ;;  %v549_v39 = vmin.f32 %v540_v57, %v542_v63 }
 0x165   :  { %547 = vmax.xlane.f32.xlu0 %v546_v41 }
 0x169   :  { %550 = vmin.xlane.f32.xlu0 %v549_v39 }
 0x1f2   :  { %v548_v51 = vpop.xlane.xlu0 %547 }
 0x1f6   :  { %v551_v37 = vpop.xlane.xlu0 %550 }
 0x1f7   :  { %v552_v35 = vsub.f32 %v548_v51, %v551_v37  ;;  %v556_v1 = vsub.f32 %v540_v57, %v551_v37  ;;  %v557_v33 = vsub.f32 %v542_v63, %v551_v37 }
 0x1f9   :  { %vm553_vm0 = vcmp.gt.f32.partialorder %v552_v35, 0.0 }
 0x1fa   :  { %v554_v0 = vsel %vm553_vm0, %v552_v35, 1.0 }
 0x1fb   :  { %944 = vrcp.f32 %v554_v0 }
 0x205   :  { %v945_v58 = vpop.eup %944 }
 0x206   :  { %v558_v60 = vmul.f32 %v945_v58, %v556_v1  ;;  %v559_v31 = vmul.f32 %v945_v58, %v557_v33 }
 0x208   :  { %v565_v53 = vpack.c.bf16 %v558_v60, %v558_v60  ;;  %v566_v50 = vpack.c.bf16 %v559_v31, %v559_v31  ;;  %v562_v45 = vcombine.low %v558_v60, %v559_v31 }
 0x20a   :  { %599 = vmatprep.mubr.bf16.mxu1 %v566_v50  ;;  %564 = vst [vmem:[#allocation11] sm:$0xff] %v562_v45 }
 0x20b   :  { %600 = vmatmul.mubr.bf16.vlgmr.msra.gmra.mrb[4].mxu1 %v565_v53 }
 0x20c   :  { %609 = vmatpush1.bf16.msra.mxu1 %v1186_v2  ;;  %640 = vmatprep.mubr.bf16.mxu1 %v566_v50 }
 0x20d   :  { %610 = vmatprep.subr.bf16.mxu1 %v1191_v4 }
 0x210   :  { %611 = vmatpush1.bf16.msra.mxu1 %v1197_v6 }
 0x211   :  { %612 = vmatprep.subr.bf16.mxu1 %v1203_v8 }
 0x214   :  { %613 = vmatpush1.bf16.msra.mxu1 %v1207_v10 }
 0x215   :  { %614 = vmatprep.subr.bf16.mxu1 %v1213_v12 }
 0x218   :  { %615 = vmatpush1.bf16.msra.mxu1 %v1219_v14 }
 0x219   :  { %616 = vmatprep.subr.bf16.mxu1 %v1225_v16 }
 0x21c   :  { %617 = vmatpush1.bf16.msra.mxu1 %v1231_v18 }
 0x21d   :  { %618 = vmatprep.subr.bf16.mxu1 %v1237_v20 }
 0x220   :  { %619 = vmatpush1.bf16.msra.mxu1 %v1243_v22 }
 0x221   :  { %620 = vmatprep.subr.bf16.mxu1 %v1249_v24  ;;  %v1588_v24 = vld [vmem:[#allocation29_spill] sm:$0xff] }
 0x224   :  { %621 = vmatpush1.bf16.msra.mxu1 %v1255_v26  ;;  %v1590_v26 = vld [vmem:[#allocation33_spill] sm:$0xff] }
 0x225   :  { %622 = vmatprep.subr.bf16.mxu1 %v1261_v28  ;;  %v1592_v28 = vld [vmem:[#allocation35_spill] sm:$0xff] }
 0x228   :  { %623 = vmatpush1.bf16.msra.mxu1 %v1267_v30 }
 0x229   :  { %624 = vmatprep.subr.bf16.mxu1 %v1273_v32 }
 0x22c   :  { %625 = vmatpush1.bf16.msra.mxu1 %v1279_v34 }
 0x22d   :  { %626 = vmatprep.subr.bf16.mxu1 %v1285_v36 }
 0x230   :  { %627 = vmatpush1.bf16.msra.mxu1 %v1291_v38 }
 0x231   :  { %628 = vmatprep.subr.bf16.mxu1 %v1297_v40 }
 0x234   :  { %629 = vmatpush1.bf16.msra.mxu1 %v1303_v42 }
 0x235   :  { %630 = vmatprep.subr.bf16.mxu1 %v1309_v44 }
 0x238   :  { %631 = vmatpush1.bf16.msra.mxu1 %v1317_v49 }
 0x239   :  { %632 = vmatprep.subr.bf16.mxu1 %v1323_v52 }
 0x23c   :  { %633 = vmatpush1.bf16.msra.mxu1 %v1329_v54 }
 0x23d   :  { %634 = vmatprep.subr.bf16.mxu1 %v1335_v56 }
 0x240   :  { %635 = vmatpush1.bf16.msra.mxu1 %v1574_v59 }
 0x241   :  { %636 = vmatprep.subr.bf16.mxu1 %v1576_v61 }
 0x244   :  { %637 = vmatpush1.bf16.msra.mxu1 %v1353_v62 }
 0x245   :  { %638 = vmatprep.subr.bf16.mxu1 %v1359_v46 }
 0x248   :  { %639 = vmatpush1.bf16.msra.mxu1 %v1363_v48 }
 0x24b   :  { %641 = vmatmul.mubr.bf16.vlgmr.msra.gmra.mrb[8].mxu1 %v565_v53 }
 0x2de   :  { %v601_v2 = vpop.f32.mrb[4].mxu1 }
 0x2df   :  { %v603_v4 = vpop.f32.mrb[5].mxu1  ;;  %v649_v30 = vpack.c.bf16 %v601_v2, %v601_v2 }
 0x2e0   :  { %v605_v6 = vpop.f32.mrb[6].mxu1  ;;  %v650_v22 = vpack.c.bf16 %v603_v4, %v603_v4 }
 0x2e1   :  { %v606_v8 = vpop.f32.mrb[7].mxu1 }
 0x31e   :  { %v642_v10 = vpop.f32.mrb[8].mxu1 }
 0x31f   :  { %v644_v12 = vpop.f32.mrb[9].mxu1  ;;  %v651_v18 = vpack.c.bf16 %v642_v10, %v642_v10 }
 0x320   :  { %v652_v14 = vpack.c.bf16 %v644_v12, %v644_v12  ;;  %v646_v16 = vpop.f32.mrb[10].mxu1 }
 0x321   :  { %v647_v20 = vpop.f32.mrb[11].mxu1 }
 0x322   :  { %685 = vmatprep.mubr.bf16.mxu0 %v652_v14 }
 0x323   :  { %686 = vmatmul.mubr.bf16.vlgmr.msra.gmra.mrb[4].mxu0 %v651_v18 }
 0x324   :  { %695 = vmatpush1.bf16.msra.mxu0 %v1188_v3  ;;  %726 = vmatprep.mubr.bf16.mxu0 %v650_v22  ;;  %v1577_v3 = vld [vmem:[#allocation18_spill] sm:$0xff] }
 0x325   :  { %696 = vmatprep.subr.bf16.mxu0 %v1195_v5  ;;  %v1578_v5 = vld [vmem:[#allocation19_spill] sm:$0xff] }
 0x328   :  { %697 = vmatpush1.bf16.msra.mxu0 %v1200_v7  ;;  %v1579_v7 = vld [vmem:[#allocation20_spill] sm:$0xff] }
 0x329   :  { %698 = vmatprep.subr.bf16.mxu0 %v1205_v9  ;;  %v1580_v9 = vld [vmem:[#allocation21_spill] sm:$0xff] }
 0x32c   :  { %699 = vmatpush1.bf16.msra.mxu0 %v1209_v11  ;;  %v1581_v11 = vld [vmem:[#allocation22_spill] sm:$0xff] }
 0x32d   :  { %700 = vmatprep.subr.bf16.mxu0 %v1217_v13  ;;  %v1582_v13 = vld [vmem:[#allocation23_spill] sm:$0xff] }
 0x330   :  { %701 = vmatpush1.bf16.msra.mxu0 %v1223_v15  ;;  %v1583_v15 = vld [vmem:[#allocation24_spill] sm:$0xff] }
 0x331   :  { %702 = vmatprep.subr.bf16.mxu0 %v1229_v17  ;;  %v1584_v17 = vld [vmem:[#allocation25_spill] sm:$0xff] }
 0x334   :  { %703 = vmatpush1.bf16.msra.mxu0 %v1233_v19  ;;  %v1585_v19 = vld [vmem:[#allocation26_spill] sm:$0xff] }
 0x335   :  { %704 = vmatprep.subr.bf16.mxu0 %v1241_v21  ;;  %v1586_v21 = vld [vmem:[#allocation27_spill] sm:$0xff] }
 0x338   :  { %705 = vmatpush1.bf16.msra.mxu0 %v1247_v23  ;;  %v1587_v23 = vld [vmem:[#allocation28_spill] sm:$0xff] }
 0x339   :  { %706 = vmatprep.subr.bf16.mxu0 %v1253_v25  ;;  %v1589_v25 = vld [vmem:[#allocation31_spill] sm:$0xff] }
 0x33c   :  { %707 = vmatpush1.bf16.msra.mxu0 %v1257_v27  ;;  %v1591_v27 = vld [vmem:[#allocation34_spill] sm:$0xff] }
 0x33d   :  { %708 = vmatprep.subr.bf16.mxu0 %v1265_v29  ;;  %v1593_v29 = vld [vmem:[#allocation36_spill] sm:$0xff] }
 0x340   :  { %709 = vmatpush1.bf16.msra.mxu0 %v1577_v3 }
 0x341   :  { %710 = vmatprep.subr.bf16.mxu0 %v1578_v5 }
 0x344   :  { %711 = vmatpush1.bf16.msra.mxu0 %v1579_v7 }
 0x345   :  { %712 = vmatprep.subr.bf16.mxu0 %v1580_v9 }
 0x348   :  { %713 = vmatpush1.bf16.msra.mxu0 %v1581_v11 }
 0x349   :  { %714 = vmatprep.subr.bf16.mxu0 %v1582_v13 }
 0x34c   :  { %715 = vmatpush1.bf16.msra.mxu0 %v1583_v15 }
 0x34d   :  { %716 = vmatprep.subr.bf16.mxu0 %v1584_v17 }
 0x350   :  { %717 = vmatpush1.bf16.msra.mxu0 %v1585_v19 }
 0x351   :  { %718 = vmatprep.subr.bf16.mxu0 %v1586_v21 }
 0x354   :  { %719 = vmatpush1.bf16.msra.mxu0 %v1587_v23 }
 0x355   :  { %720 = vmatprep.subr.bf16.mxu0 %v1588_v24 }
 0x358   :  { %721 = vmatpush1.bf16.msra.mxu0 %v1589_v25 }
 0x359   :  { %722 = vmatprep.subr.bf16.mxu0 %v1590_v26 }
 0x35c   :  { %723 = vmatpush1.bf16.msra.mxu0 %v1591_v27 }
 0x35d   :  { %724 = vmatprep.subr.bf16.mxu0 %v1592_v28 }
 0x360   :  { %725 = vmatpush1.bf16.msra.mxu0 %v1593_v29 }
 0x363   :  { %727 = vmatmul.mubr.bf16.vlgmr.msra.gmra.mrb[4].mxu0 %v649_v30 }
 0x364   :  { %1045 = shalt.err (!%p1042_p8)
}
 0x365   :  { %s1046_s18 = scalar_lea.hbm %s1530_s5, 128 }
 0x366   :  { %p1047_p9 = scmp.ne.s32.totalorder %s1530_s5, %s1046_s18  ;;  %p1050_p10 = scmp.lt.u32.totalorder %s1046_s18, %s1530_s5 }
 0x368   :  { %p1052_p11 = pnand %p1050_p10, %p1047_p9 }
 0x36a   :  { %1055 = shalt.err (!%p1052_p11)
}
 0x36b   :  { %758 = dma.vmem_to_hbm [thread:$0]  %s756_s15, 128, %s1530_s5, [#allocation12]  }
 0x36c   :  { %s1095_s26 = smov [#allocation10]  }
 0x36d   :  { %s745_s27 = sshll.u32 %s1095_s26, 4  ;;  %s746_s27 = int_to_ptr.vmem [resolvable:$true] %s745_s27 }
 0x36e   :  { %s1056_s28 = scalar_lea.vmem %s746_s27, 256  ;;  %p1061_p13 = scmp.lt.s32.totalorder %s746_s27, %s746_s27 }
 0x36f   :  { %p1057_p12 = scmp.ne.s32.totalorder %s746_s27, %s1056_s28  ;;  %p1062_p0 = scmp.lt.s32.totalorder %s1056_s28, %s1056_s28 }
 0x371   :  { %p1063_p1 = por %p1062_p0, %p1061_p13 }
 0x373   :  { %p1064_p2 = pnand %p1063_p1, %p1057_p12 }
 0x436   :  { %v728_v31 = vpop.f32.mrb[4].mxu0 }
 0x437   :  { %v735_v32 = vmul.f32 0.00390625, %v728_v31  ;;  %v730_v33 = vpop.f32.mrb[5].mxu0 }
 0x438   :  { %v736_v34 = vmul.f32 0.00390625, %v730_v33  ;;  %v732_v35 = vpop.f32.mrb[6].mxu0 }
 0x439   :  { %737 = vst [vmem:[#allocation10] sm:$0xff] %v735_v32  ;;  %v733_v36 = vpop.f32.mrb[7].mxu0 }
 0x43a   :  { %738 = vst [vmem:[#allocation10 + $0x8] sm:$0xff] %v736_v34 }
 0x43b   :  { %1067 = shalt.err (!%p1064_p2)
}
 0x43c   :  { %s1068_s0 = scalar_lea.hbm %s1529_s4, 256 }
 0x43d   :  { %p1069_p3 = scmp.ne.s32.totalorder %s1529_s4, %s1068_s0  ;;  %p1072_p4 = scmp.lt.u32.totalorder %s1068_s0, %s1529_s4 }
 0x43f   :  { %p1074_p5 = pnand %p1072_p4, %p1069_p3 }
 0x441   :  { %1077 = shalt.err (!%p1074_p5)
}
 0x442   :  { %748 = dma.vmem_to_hbm [thread:$0]  %s746_s27, 256, %s1529_s4, [#allocation4]  }
 0x443   :  { %1084 = dma.done.wait [#allocation4], 256  }
 0x444   :  { %1085 = vsyncadd [#allocation4], 4294967040 }
 0x445   :  { %1086 = dma.done.wait [#allocation12], 128  }
 0x446   :  { %1087 = vsyncadd [#allocation12], 4294967168 }
 0x447   :  { %765 = vsyncpa [#allocation3], 1 }
 0x448   :  { %766 = vsyncpa [#allocation6], 1 }
 0x449   :  { %767 = vsyncpa [#allocation9], 1 }
 0x44a   :  { %768 = vsyncpa [#allocation4], 1 }
 0x44b   :  { %769 = vsyncpa [#allocation12], 1 }

</bundles_post_ra>
